<compile_context>
chip_gen: v6e
topology: v6e:2x2x1
jax: 0.10.0
libtpu: 0.0.40
codegen_flags: <defaults>
</compile_context>

<pallas_src>
import jax
import jax.numpy as jnp
from jax.experimental import pallas as pl
from jax.experimental.pallas import tpu as pltpu


# ------------------------------- kernels ------------------------------------

def lstm_cell_kernel(x_ref, hx_ref, cx_ref, wx_ref, wh_ref, b_ref,
                     hy_ref, cy_ref, og_ref):
    """One LSTM step.  Gate column order is [i | f | o | g] (pre-packed)."""
    Hp = hx_ref.shape[1]
    wdt = wx_ref.dtype
    # Two MXU dots (no lane-axis concat of [x, h]); f32 accumulation.
    gates = (jnp.dot(x_ref[...].astype(wdt), wx_ref[...],
                     preferred_element_type=jnp.float32)
             + jnp.dot(hx_ref[...].astype(wdt), wh_ref[...],
                       preferred_element_type=jnp.float32)
             + b_ref[...])
    sig = jax.nn.sigmoid(gates[:, :3 * Hp])          # i | f | o (contiguous)
    g = jnp.tanh(gates[:, 3 * Hp:])                  # cell gate
    i = sig[:, :Hp]
    f = sig[:, Hp:2 * Hp]
    o = sig[:, 2 * Hp:]
    cy = f * cx_ref[...].astype(jnp.float32) + i * g
    hy = o * jnp.tanh(cy)
    # Three separate lane-dense stores (no packed-slab concat).
    hy_ref[...] = hy.astype(hy_ref.dtype)
    cy_ref[...] = cy.astype(cy_ref.dtype)
    og_ref[...] = o.astype(og_ref.dtype)


def lstm_sequence_kernel(x_ref, h0_ref, c0_ref, wx_ref, wh_ref, b_ref,
                         hy_ref, cy_ref, og_ref, h_sc, c_sc):
    """Tu timesteps per grid step; h/c carried in f32 VMEM scratch."""
    tu, bb, in_sz = x_ref.shape
    Hp = h_sc.shape[1]
    wdt = wx_ref.dtype

    @pl.when(pl.program_id(1) == 0)       # first T-block of this batch block
    def _():
        h_sc[...] = h0_ref[...].astype(jnp.float32)
        c_sc[...] = c0_ref[...].astype(jnp.float32)

    # Hoisted input projection: ONE (tu*bb, I) x (I, 4Hp) GEMM per grid step,
    # bias folded in once per block (not re-broadcast every timestep).
    xp = jnp.dot(x_ref[...].reshape(tu * bb, in_sz).astype(wdt),
                 wx_ref[...], preferred_element_type=jnp.float32) + b_ref[...]

    w_h = wh_ref[...]
    h = h_sc[...]
    c = c_sc[...]
    # Fully unrolled inner loop over Tu timesteps (amortizes per-grid-step
    # overhead); only the small K=Hp recurrent dot is on the serial path.
    for t in range(tu):
        gates = xp[t * bb:(t + 1) * bb] + jnp.dot(
            h.astype(wdt), w_h, preferred_element_type=jnp.float32)
        sig = jax.nn.sigmoid(gates[:, :3 * Hp])
        g = jnp.tanh(gates[:, 3 * Hp:])
        i = sig[:, :Hp]
        f = sig[:, Hp:2 * Hp]
        o = sig[:, 2 * Hp:]
        c = f * c + i * g
        h = o * jnp.tanh(c)
        hy_ref[t] = h.astype(hy_ref.dtype)
        cy_ref[t] = c.astype(cy_ref.dtype)
        og_ref[t] = o.astype(og_ref.dtype)
    h_sc[...] = h
    c_sc[...] = c


# ------------------------------ parameter prep ------------------------------

def prepare_lstm_params(weight_ih, weight_hh, bias_ih, bias_hh,
                        param_dtype=jnp.float32, lane_multiple=128):
    """One-time prep (hoisted out of the per-step path).

    Returns (w_x, w_h, bias):
      w_x  : (I,  4Hp)  = W_ih^T, gate columns reordered [i|f|o|g], H padded to Hp
      w_h  : (Hp, 4Hp)  = W_hh^T, same reorder/pad (zero-padded rows/cols)
      bias : (1,  4Hp)  = b_ih + b_hh, same reorder/pad, kept f32
    Hp = H rounded up to `lane_multiple` so all gate slices are lane-aligned.
    Padded gate columns are zero -> padded h/c lanes stay exactly 0.
    """
    H4, _ = weight_ih.shape
    H = H4 // 4
    Hp = -(-H // lane_multiple) * lane_multiple

    def reorder_rows(w):   # torch gate row order [i|f|g|o] -> [i|f|o|g]
        return jnp.concatenate([w[:2 * H], w[3 * H:], w[2 * H:3 * H]], axis=0)

    def pad_gate_cols(m):  # (rows, 4H) -> (rows, 4Hp), per-gate zero pad
        if Hp == H:
            return m
        r = m.shape[0]
        m4 = m.reshape(r, 4, H)
        m4 = jnp.pad(m4, ((0, 0), (0, 0), (0, Hp - H)))
        return m4.reshape(r, 4 * Hp)

    w_x = pad_gate_cols(jnp.transpose(reorder_rows(weight_ih)))   # (I, 4Hp)
    w_h = pad_gate_cols(jnp.transpose(reorder_rows(weight_hh)))   # (H, 4Hp)
    if Hp != H:
        w_h = jnp.pad(w_h, ((0, Hp - H), (0, 0)))                 # (Hp, 4Hp)

    b = bias_ih + bias_hh
    b = jnp.concatenate([b[:2 * H], b[3 * H:], b[2 * H:3 * H]]).reshape(1, 4 * H)
    b = pad_gate_cols(b)

    return (w_x.astype(param_dtype), w_h.astype(param_dtype),
            b.astype(jnp.float32))


# -------------------------------- wrappers -----------------------------------

def lstm_cell(x, hx, cx, w_x, w_h, bias):
    """Single-step Pallas LSTMCell forward (matches the module's forward)."""
    B, _ = x.shape
    H = hx.shape[1]
    Hp = w_h.shape[0]
    if Hp != H:
        hx = jnp.pad(hx, ((0, 0), (0, Hp - H)))
        cx = jnp.pad(cx, ((0, 0), (0, Hp - H)))

    vmem = pl.BlockSpec(memory_space=pltpu.MemorySpace.VMEM)
    hy, cy, og = pl.pallas_call(
        lstm_cell_kernel,
        out_shape=(jax.ShapeDtypeStruct((B, Hp), x.dtype),) * 3,
        in_specs=[vmem] * 6,          # x, hx, cx, w_x, w_h, bias
        out_specs=(vmem,) * 3,        # hy, cy, outgate
    )(x, hx, cx, w_x, w_h, bias)
    if Hp != H:
        hy, cy, og = hy[:, :H], cy[:, :H], og[:, :H]
    return hy, cy, og


def lstm_sequence(x_seq, h0, c0, w_x, w_h, bias, *, tu=4, block_b=None):
    """Fused T-step LSTM recurrence: one pallas_call, weights resident in VMEM.

    Returns per-step (hy, cy, outgate), each (T, B, H).
    """
    T, B, I = x_seq.shape
    H = h0.shape[1]
    Hp = w_h.shape[0]
    assert w_x.shape == (I, 4 * Hp) and w_h.shape == (Hp, 4 * Hp)
    assert bias.shape == (1, 4 * Hp)

    bb = B if block_b is None else block_b
    assert B % bb == 0
    nb = B // bb
    nt = -(-T // tu)
    Tp = nt * tu
    if Tp != T:
        x_seq = jnp.pad(x_seq, ((0, Tp - T), (0, 0), (0, 0)))
    if Hp != H:
        h0 = jnp.pad(h0, ((0, 0), (0, Hp - H)))
        c0 = jnp.pad(c0, ((0, 0), (0, Hp - H)))

    hs, cs, os_ = pl.pallas_call(
        lstm_sequence_kernel,
        out_shape=(jax.ShapeDtypeStruct((Tp, B, Hp), x_seq.dtype),) * 3,
        grid=(nb, nt),
        in_specs=[
            pl.BlockSpec((tu, bb, I), lambda b, t: (t, b, 0)),       # x streamed
            pl.BlockSpec((bb, Hp), lambda b, t: (b, 0)),             # h0
            pl.BlockSpec((bb, Hp), lambda b, t: (b, 0)),             # c0
            pl.BlockSpec((I, 4 * Hp), lambda b, t: (0, 0)),          # w_x resident
            pl.BlockSpec((Hp, 4 * Hp), lambda b, t: (0, 0)),         # w_h resident
            pl.BlockSpec((1, 4 * Hp), lambda b, t: (0, 0)),          # bias resident
        ],
        out_specs=(pl.BlockSpec((tu, bb, Hp), lambda b, t: (t, b, 0)),) * 3,
        scratch_shapes=[pltpu.VMEM((bb, Hp), jnp.float32),   # h carry
                        pltpu.VMEM((bb, Hp), jnp.float32)],  # c carry
        compiler_params=pltpu.CompilerParams(
            # batch axis parallel (v7x megacore), T axis serial recurrence
            dimension_semantics=("parallel", "arbitrary"),
            # raise v5e's 16 MiB default scoped-VMEM limit
            vmem_limit_bytes=64 * 1024 * 1024),
    )(x_seq, h0, c0, w_x, w_h, bias)

    if Tp != T:
        hs, cs, os_ = hs[:T], cs[:T], os_[:T]
    if Hp != H:
        hs, cs, os_ = hs[..., :H], cs[..., :H], os_[..., :H]
    return hs, cs, os_


# --------------------------- reference (pure JAX) ----------------------------

def xavier_uniform(key, shape):
    fan_out, fan_in = shape
    limit = jnp.sqrt(6.0 / (fan_in + fan_out))
    return jax.random.uniform(key, shape, jnp.float32, -limit, limit)


def orthogonal(key, shape):
    rows, cols = shape
    n = max(rows, cols)
    a = jax.random.normal(key, (n, n), jnp.float32)
    q, r = jnp.linalg.qr(a)
    q = q * jnp.sign(jnp.diag(r))
    return q[:rows, :cols]


def reference_lstm_cell(x, hx, cx, weight_ih, weight_hh, bias_ih, bias_hh):
    hp = jax.lax.Precision.HIGHEST
    gates = (jnp.dot(x, weight_ih.T, precision=hp) + bias_ih
             + jnp.dot(hx, weight_hh.T, precision=hp) + bias_hh)
    H = hx.shape[1]
    i = jax.nn.sigmoid(gates[:, 0 * H:1 * H])
    f = jax.nn.sigmoid(gates[:, 1 * H:2 * H])
    g = jnp.tanh(gates[:, 2 * H:3 * H])
    o = jax.nn.sigmoid(gates[:, 3 * H:4 * H])
    cy = f * cx + i * g
    hy = o * jnp.tanh(cy)
    return hy, cy, o


def reference_lstm_sequence(x_seq, h0, c0, weight_ih, weight_hh,
                            bias_ih, bias_hh):
    def step(carry, xt):
        h, c = carry
        hy, cy, o = reference_lstm_cell(xt, h, c, weight_ih, weight_hh,
                                        bias_ih, bias_hh)
        return (hy, cy), (hy, cy, o)
    _, (hs, cs, os_) = jax.lax.scan(step, (h0, c0), x_seq)
    return hs, cs, os_


# ---------------------------------- main -------------------------------------

if __name__ == "__main__":
    B, I, H, T, TU = 8, 32, 32, 8, 4   # batch, input_size, hidden_size, seq, unroll

    key = jax.random.PRNGKey(0)
    k_wih, k_whh, k_bih, k_bhh, k_x, k_h, k_c, k_xs = jax.random.split(key, 8)

    weight_ih = xavier_uniform(k_wih, (4 * H, I))
    weight_hh = orthogonal(k_whh, (4 * H, H))
    # Module init zeroes biases; use small random biases to exercise the path.
    bias_ih = 0.1 * jax.random.normal(k_bih, (4 * H,), jnp.float32)
    bias_hh = 0.1 * jax.random.normal(k_bhh, (4 * H,), jnp.float32)

    x = jax.random.normal(k_x, (B, I), jnp.float32)
    hx = jax.random.normal(k_h, (B, H), jnp.float32)
    cx = jax.random.normal(k_c, (B, H), jnp.float32)
    x_seq = jax.random.normal(k_xs, (T, B, I), jnp.float32)

    # ---------------- f32 parameters ----------------
    w_x, w_h, bias = prepare_lstm_params(weight_ih, weight_hh, bias_ih, bias_hh)

    # Single cell step (matches the PyTorch module's forward)
    hy, cy, og = lstm_cell(x, hx, cx, w_x, w_h, bias)
    jax.block_until_ready((hy, cy, og))
    hy_r, cy_r, og_r = reference_lstm_cell(x, hx, cx, weight_ih, weight_hh,
                                           bias_ih, bias_hh)
    assert jnp.allclose(hy, hy_r, atol=2e-4, rtol=2e-4)
    assert jnp.allclose(cy, cy_r, atol=2e-4, rtol=2e-4)
    assert jnp.allclose(og, og_r, atol=2e-4, rtol=2e-4)

    # Fused multi-step recurrence (one pallas_call, Tu steps per grid iter)
    hs, cs, os_ = lstm_sequence(x_seq, hx, cx, w_x, w_h, bias, tu=TU)
    jax.block_until_ready((hs, cs, os_))
    hs_r, cs_r, os_r = reference_lstm_sequence(x_seq, hx, cx, weight_ih,
                                               weight_hh, bias_ih, bias_hh)
    assert jnp.allclose(hs, hs_r, atol=2e-4, rtol=2e-4)
    assert jnp.allclose(cs, cs_r, atol=2e-4, rtol=2e-4)
    assert jnp.allclose(os_, os_r, atol=2e-4, rtol=2e-4)

    # ---------------- bf16 weights (half DMA/VMEM, native bf16 MXU) ----------
    w_x16, w_h16, bias16 = prepare_lstm_params(
        weight_ih, weight_hh, bias_ih, bias_hh, param_dtype=jnp.bfloat16)
    hs16, cs16, os16 = lstm_sequence(x_seq, hx, cx, w_x16, w_h16, bias16, tu=TU)
    jax.block_until_ready((hs16, cs16, os16))
    assert jnp.allclose(hs16, hs_r, atol=5e-2, rtol=5e-2)
    assert jnp.allclose(cs16, cs_r, atol=5e-2, rtol=5e-2)
    assert jnp.allclose(os16, os_r, atol=5e-2, rtol=5e-2)

    print("KERNEL_OK")
</pallas_src>

<mosaic_0001>
module attributes {stable_mosaic.version = 11 : i64} {
  func.func @lstm_cell_kernel(%arg0: memref<8x32xf32, #tpu.memory_space<vmem>>, %arg1: memref<8x128xf32, #tpu.memory_space<vmem>>, %arg2: memref<8x128xf32, #tpu.memory_space<vmem>>, %arg3: memref<32x512xf32, #tpu.memory_space<vmem>>, %arg4: memref<128x512xf32, #tpu.memory_space<vmem>>, %arg5: memref<1x512xf32, #tpu.memory_space<vmem>>, %arg6: memref<8x128xf32, #tpu.memory_space<vmem>>, %arg7: memref<8x128xf32, #tpu.memory_space<vmem>>, %arg8: memref<8x128xf32, #tpu.memory_space<vmem>>) attributes {dimension_semantics = [], scalar_prefetch = 0 : i64, scratch_operands = 0 : i64, tpu.core_type = #tpu.core_type<tc>} {
    %c0 = arith.constant 0 : index
    %c0_0 = arith.constant 0 : index
    %0 = vector.load %arg0[%c0, %c0_0] : memref<8x32xf32, #tpu.memory_space<vmem>>, vector<8x32xf32>
    %c0_1 = arith.constant 0 : index
    %c0_2 = arith.constant 0 : index
    %1 = vector.load %arg3[%c0_1, %c0_2] : memref<32x512xf32, #tpu.memory_space<vmem>>, vector<32x512xf32>
    %cst = arith.constant dense<0.000000e+00> : vector<8x512xf32>
    %2 = tpu.matmul %0, %1, %cst {dimension_numbers = #tpu.dot_dimension_numbers<[1], [0], [0], [1], [0, 0, 1, 1], [], []>} : vector<8x32xf32>, vector<32x512xf32>, vector<8x512xf32> -> vector<8x512xf32>
    %c0_3 = arith.constant 0 : index
    %c0_4 = arith.constant 0 : index
    %3 = vector.load %arg1[%c0_3, %c0_4] : memref<8x128xf32, #tpu.memory_space<vmem>>, vector<8x128xf32>
    %c0_5 = arith.constant 0 : index
    %c0_6 = arith.constant 0 : index
    %4 = vector.load %arg4[%c0_5, %c0_6] : memref<128x512xf32, #tpu.memory_space<vmem>>, vector<128x512xf32>
    %cst_7 = arith.constant dense<0.000000e+00> : vector<8x512xf32>
    %5 = tpu.matmul %3, %4, %cst_7 {dimension_numbers = #tpu.dot_dimension_numbers<[1], [0], [0], [1], [0, 0, 1, 1], [], []>} : vector<8x128xf32>, vector<128x512xf32>, vector<8x512xf32> -> vector<8x512xf32>
    %6 = arith.addf %2, %5 : vector<8x512xf32>
    %c0_8 = arith.constant 0 : index
    %c0_9 = arith.constant 0 : index
    %7 = vector.load %arg5[%c0_8, %c0_9] : memref<1x512xf32, #tpu.memory_space<vmem>>, vector<1x512xf32>
    %8 = vector.broadcast %7 : vector<1x512xf32> to vector<8x512xf32>
    %9 = arith.addf %6, %8 : vector<8x512xf32>
    %10 = vector.extract_strided_slice %9 {offsets = [0, 0], sizes = [8, 384], strides = [1, 1]} : vector<8x512xf32> to vector<8x384xf32>
    %11 = arith.negf %10 : vector<8x384xf32>
    %12 = math.exp %11 : vector<8x384xf32>
    %cst_10 = arith.constant 1.000000e+00 : f32
    %13 = vector.broadcast %cst_10 : f32 to vector<8x384xf32>
    %14 = arith.addf %13, %12 : vector<8x384xf32>
    %15 = arith.divf %13, %14 : vector<8x384xf32>
    %16 = vector.extract_strided_slice %9 {offsets = [0, 384], sizes = [8, 128], strides = [1, 1]} : vector<8x512xf32> to vector<8x128xf32>
    %17 = math.tanh %16 : vector<8x128xf32>
    %18 = vector.extract_strided_slice %15 {offsets = [0, 0], sizes = [8, 128], strides = [1, 1]} : vector<8x384xf32> to vector<8x128xf32>
    %19 = vector.extract_strided_slice %15 {offsets = [0, 128], sizes = [8, 128], strides = [1, 1]} : vector<8x384xf32> to vector<8x128xf32>
    %20 = vector.extract_strided_slice %15 {offsets = [0, 256], sizes = [8, 128], strides = [1, 1]} : vector<8x384xf32> to vector<8x128xf32>
    %c0_11 = arith.constant 0 : index
    %c0_12 = arith.constant 0 : index
    %21 = vector.load %arg2[%c0_11, %c0_12] : memref<8x128xf32, #tpu.memory_space<vmem>>, vector<8x128xf32>
    %22 = arith.mulf %19, %21 : vector<8x128xf32>
    %23 = arith.mulf %18, %17 : vector<8x128xf32>
    %24 = arith.addf %22, %23 : vector<8x128xf32>
    %25 = math.tanh %24 : vector<8x128xf32>
    %26 = arith.mulf %20, %25 : vector<8x128xf32>
    %c0_13 = arith.constant 0 : index
    %c0_14 = arith.constant 0 : index
    %27 = vector.load %arg6[%c0_13, %c0_14] : memref<8x128xf32, #tpu.memory_space<vmem>>, vector<8x128xf32>
    tpu.vector_store %arg6[%c0_13, %c0_14], %26 {strides = array<i32>} : memref<8x128xf32, #tpu.memory_space<vmem>>, vector<8x128xf32>,
    %c0_15 = arith.constant 0 : index
    %c0_16 = arith.constant 0 : index
    %28 = vector.load %arg7[%c0_15, %c0_16] : memref<8x128xf32, #tpu.memory_space<vmem>>, vector<8x128xf32>
    tpu.vector_store %arg7[%c0_15, %c0_16], %24 {strides = array<i32>} : memref<8x128xf32, #tpu.memory_space<vmem>>, vector<8x128xf32>,
    %c0_17 = arith.constant 0 : index
    %c0_18 = arith.constant 0 : index
    %29 = vector.load %arg8[%c0_17, %c0_18] : memref<8x128xf32, #tpu.memory_space<vmem>>, vector<8x128xf32>
    tpu.vector_store %arg8[%c0_17, %c0_18], %20 {strides = array<i32>} : memref<8x128xf32, #tpu.memory_space<vmem>>, vector<8x128xf32>,
    return
  }
}

</mosaic_0001>

<bundles_post_ra>
// kernel: tpu_custom_call.1
= control target key start
LH: loop header
LB: loop body
LE: loop exit
PB: predicated region body
PF: predicated region fallthrough
CT: control target
= control target key end

     0   :  { %14 = vsyncpa [#allocation3], 0  ;;  %s855_s0 = inlined_call_operand.hbm [shape: f32[8,32], index: 0, kind: input, shape index: {}]   ;;  %s856_s1 = inlined_call_operand.hbm [shape: f32[8,128], index: 1, kind: input, shape index: {}]   ;;  %s857_s2 = inlined_call_operand.hbm [shape: f32[8,128], index: 2, kind: input, shape index: {}]   ;;  %s858_s3 = inlined_call_operand.hbm [shape: f32[32,512], index: 3, kind: input, shape index: {}]   ;;  %s859_s4 = inlined_call_operand.hbm [shape: f32[128,512], index: 4, kind: input, shape index: {}]   ;;  %s860_s5 = inlined_call_operand.vmem [shape: f32[1,512], index: 5, kind: input, shape index: {}]   ;;  %s861_s6 = inlined_call_operand.hbm [shape: f32[8,128], index: 6, kind: output, shape index: {0}]   ;;  %s862_s7 = inlined_call_operand.hbm [shape: f32[8,128], index: 7, kind: output, shape index: {1}]   ;;  %s863_s8 = inlined_call_operand.hbm [shape: f32[8,128], index: 8, kind: output, shape index: {2}]  }
   0x1   :  { %15 = vsyncpa [#allocation6], 0 }
   0x2   :  { %16 = vsyncpa [#allocation9], 0 }
   0x3   :  { %17 = vsyncpa [#allocation4], 0 }
   0x4   :  { %18 = vsyncpa [#allocation13], 0  ;;  %s760_s27 = smov [#allocation5]   ;;  %s761_s29 = smov [#allocation8]  }
   0x5   :  { %s35_s28 = sshll.u32 %s760_s27, 4  ;;  %s54_s30 = sshll.u32 %s761_s29, 4  ;;  %s36_s28 = int_to_ptr.vmem [resolvable:$true] %s35_s28  ;;  %s55_s30 = int_to_ptr.vmem [resolvable:$true] %s54_s30 }
   0x6   :  { %s598_s9 = scalar_lea.vmem %s36_s28, 128  ;;  %p603_p1 = scmp.lt.s32.totalorder %s36_s28, %s36_s28 }
   0x7   :  { %p599_p0 = scmp.ne.s32.totalorder %s36_s28, %s598_s9  ;;  %p604_p2 = scmp.lt.s32.totalorder %s598_s9, %s598_s9 }
   0x9   :  { %p605_p3 = por %p604_p2, %p603_p1 }
   0xb   :  { %p606_p4 = pnand %p605_p3, %p599_p0 }
   0xd   :  { %609 = shalt.err (!%p606_p4)
}
   0xe   :  { %38 = dma.hbm_to_vmem [thread:$0]  %s856_s1, 128, %s36_s28, [#allocation6]  }
   0xf   :  { %s618_s12 = scalar_lea.vmem %s55_s30, 2048  ;;  %p623_p6 = scmp.lt.s32.totalorder %s55_s30, %s55_s30 }
  0x10   :  { %p619_p5 = scmp.ne.s32.totalorder %s55_s30, %s618_s12  ;;  %p624_p7 = scmp.lt.s32.totalorder %s618_s12, %s618_s12 }
  0x12   :  { %p625_p8 = por %p624_p7, %p623_p6 }
  0x14   :  { %p626_p9 = pnand %p625_p8, %p619_p5 }
  0x16   :  { %629 = shalt.err (!%p626_p9)
}
  0x17   :  { %s762_s13 = smov 512   ;;  %s763_s14 = smov 32  }
  0x18   :  { %60 = dma.hbm_to_vmem [thread:$0]  %s858_s3, 2048, %s55_s30, [#allocation9], %s762_s13, %s762_s13, %s763_s14  }
  0x19   :  { %s764_s17 = smov [#allocation2]   ;;  %s765_s19 = smov [#allocation7]  }
  0x1a   :  { %s25_s18 = sshll.u32 %s764_s17, 4  ;;  %s45_s1 = sshll.u32 %s765_s19, 4  ;;  %s26_s18 = int_to_ptr.vmem [resolvable:$true] %s25_s18  ;;  %s46_s1 = int_to_ptr.vmem [resolvable:$true] %s45_s1 }
  0x1b   :  { %s638_s20 = scalar_lea.vmem %s26_s18, 128  ;;  %p643_p11 = scmp.lt.s32.totalorder %s26_s18, %s26_s18 }
  0x1c   :  { %p639_p10 = scmp.ne.s32.totalorder %s26_s18, %s638_s20  ;;  %p644_p12 = scmp.lt.s32.totalorder %s638_s20, %s638_s20 }
  0x1e   :  { %p645_p13 = por %p644_p12, %p643_p11 }
  0x20   :  { %p646_p0 = pnand %p645_p13, %p639_p10 }
  0x22   :  { %649 = shalt.err (!%p646_p0)
}
  0x23   :  { %28 = dma.hbm_to_vmem [thread:$0]  %s855_s0, 128, %s26_s18, [#allocation3]  }
  0x24   :  { %s658_s23 = scalar_lea.vmem %s46_s1, 128  ;;  %p663_p2 = scmp.lt.s32.totalorder %s46_s1, %s46_s1 }
  0x25   :  { %p659_p1 = scmp.ne.s32.totalorder %s46_s1, %s658_s23  ;;  %p664_p3 = scmp.lt.s32.totalorder %s658_s23, %s658_s23 }
  0x27   :  { %p665_p4 = por %p664_p3, %p663_p2 }
  0x29   :  { %p666_p5 = pnand %p665_p4, %p659_p1 }
  0x2b   :  { %669 = shalt.err (!%p666_p5)
}
  0x2c   :  { %48 = dma.hbm_to_vmem [thread:$0]  %s857_s2, 128, %s46_s1, [#allocation6]  }
  0x2d   :  { %s766_s25 = smov [#allocation10]  }
  0x2e   :  { %s66_s26 = sshll.u32 %s766_s25, 4  ;;  %s67_s26 = int_to_ptr.vmem [resolvable:$true] %s66_s26 }
  0x2f   :  { %s678_s27 = scalar_lea.vmem %s67_s26, 8192  ;;  %p683_p7 = scmp.lt.s32.totalorder %s67_s26, %s67_s26 }
  0x30   :  { %p679_p6 = scmp.ne.s32.totalorder %s67_s26, %s678_s27  ;;  %p684_p8 = scmp.lt.s32.totalorder %s678_s27, %s678_s27 }
  0x32   :  { %p685_p9 = por %p684_p8, %p683_p7 }
  0x34   :  { %p686_p10 = pnand %p685_p9, %p679_p6 }
  0x36   :  { %689 = shalt.err (!%p686_p10)
}
  0x37   :  { %72 = dma.hbm_to_vmem [thread:$0]  %s859_s4, 8192, %s67_s26, [#allocation9], %s762_s13, %s762_s13, %s763_s14  }
  0x38   :  { %750 = dma.done.wait [#allocation3], 128  }
  0x39   :  { %751 = vsyncadd [#allocation3], 4294967168 }
  0x3a   :  { %752 = dma.done.wait [#allocation6], 256  }
  0x3b   :  { %753 = vsyncadd [#allocation6], 4294967040 }
  0x3c   :  { %754 = dma.done.wait [#allocation9], 10240  }
  0x3d   :  { %755 = vsyncadd [#allocation9], 4294957056  ;;  %v767_v0 = vmov 0.0   ;;  %v169_v1 = vld [vmem:[#allocation10 + $0x1e8] sm:$0xff]  ;;  %v168_v2 = vld [vmem:[#allocation10 + $0x1e0] sm:$0xff]  ;;  %vm314_vm0 = vcmask 261120  }
  0x3e   :  { %236 = vmatprep.mubr.f32.mxu0 %v767_v0  ;;  %307 = vmatprep.mubr.f32.mxu1 %v767_v0  ;;  %v165_v3 = vld [vmem:[#allocation10 + $0x1c8] sm:$0xff]  ;;  %v164_v4 = vld [vmem:[#allocation10 + $0x1c0] sm:$0xff]  ;;  %v171_v7 = vld [vmem:[#allocation10 + $0x1f8] sm:$0xff]  ;;  %s769_s30 = smov [#allocation14]  }
  0x3f   :  { %172 = vmatprep.subr.mxu0 %v169_v1  ;;  %v161_v5 = vld [vmem:[#allocation10 + $0x1a8] sm:$0xff]  ;;  %v160_v6 = vld [vmem:[#allocation10 + $0x1a0] sm:$0xff]  ;;  %243 = vmatprep.subr.mxu1 %v171_v7  ;;  %v170_v9 = vld [vmem:[#allocation10 + $0x1f0] sm:$0xff]  ;;  %s540_s9 = sshll.u32 %s769_s30, 4  ;;  %s541_s9 = int_to_ptr.vmem [resolvable:$true] %s540_s9 }
  0x40   :  { %173 = vmatpush1.msra.mxu0 %v168_v2  ;;  %v157_v8 = vld [vmem:[#allocation10 + $0x188] sm:$0xff]  ;;  %v167_v10 = vld [vmem:[#allocation10 + $0x1d8] sm:$0xff]  ;;  %v156_v11 = vld [vmem:[#allocation10 + $0x180] sm:$0xff]  ;;  %244 = vmatpush1.msra.mxu1 %v170_v9 }
  0x41   :  { %174 = vmatprep.subr.mxu0 %v165_v3  ;;  %v166_v12 = vld [vmem:[#allocation10 + $0x1d0] sm:$0xff]  ;;  %v153_v13 = vld [vmem:[#allocation10 + $0x168] sm:$0xff]  ;;  %245 = vmatprep.subr.mxu1 %v167_v10  ;;  %v163_v14 = vld [vmem:[#allocation10 + $0x1b8] sm:$0xff] }
  0x42   :  { %175 = vmatpush1.msra.mxu0 %v164_v4  ;;  %v162_v15 = vld [vmem:[#allocation10 + $0x1b0] sm:$0xff]  ;;  %v152_v16 = vld [vmem:[#allocation10 + $0x160] sm:$0xff]  ;;  %246 = vmatpush1.msra.mxu1 %v166_v12  ;;  %v159_v17 = vld [vmem:[#allocation10 + $0x198] sm:$0xff] }
  0x43   :  { %176 = vmatprep.subr.mxu0 %v161_v5  ;;  %v149_v18 = vld [vmem:[#allocation10 + $0x148] sm:$0xff]  ;;  %247 = vmatprep.subr.mxu1 %v163_v14  ;;  %v158_v19 = vld [vmem:[#allocation10 + $0x190] sm:$0xff]  ;;  %v148_v20 = vld [vmem:[#allocation10 + $0x140] sm:$0xff] }
  0x44   :  { %177 = vmatpush1.msra.mxu0 %v160_v6  ;;  %248 = vmatpush1.msra.mxu1 %v162_v15  ;;  %v155_v21 = vld [vmem:[#allocation10 + $0x178] sm:$0xff]  ;;  %v145_v22 = vld [vmem:[#allocation10 + $0x128] sm:$0xff]  ;;  %v154_v23 = vld [vmem:[#allocation10 + $0x170] sm:$0xff] }
  0x45   :  { %178 = vmatprep.subr.mxu0 %v157_v8  ;;  %249 = vmatprep.subr.mxu1 %v159_v17  ;;  %v144_v24 = vld [vmem:[#allocation10 + $0x120] sm:$0xff]  ;;  %v151_v25 = vld [vmem:[#allocation10 + $0x158] sm:$0xff]  ;;  %v141_v26 = vld [vmem:[#allocation10 + $0x108] sm:$0xff] }
  0x46   :  { %179 = vmatpush1.msra.mxu0 %v156_v11  ;;  %250 = vmatpush1.msra.mxu1 %v158_v19  ;;  %v150_v27 = vld [vmem:[#allocation10 + $0x150] sm:$0xff]  ;;  %v140_v28 = vld [vmem:[#allocation10 + $0x100] sm:$0xff]  ;;  %v147_v29 = vld [vmem:[#allocation10 + $0x138] sm:$0xff] }
  0x47   :  { %180 = vmatprep.subr.mxu0 %v153_v13  ;;  %251 = vmatprep.subr.mxu1 %v155_v21  ;;  %v137_v30 = vld [vmem:[#allocation10 + $0xe8] sm:$0xff]  ;;  %v146_v31 = vld [vmem:[#allocation10 + $0x130] sm:$0xff]  ;;  %v136_v32 = vld [vmem:[#allocation10 + $0xe0] sm:$0xff] }
  0x48   :  { %181 = vmatpush1.msra.mxu0 %v152_v16  ;;  %252 = vmatpush1.msra.mxu1 %v154_v23  ;;  %v143_v33 = vld [vmem:[#allocation10 + $0x118] sm:$0xff]  ;;  %v133_v34 = vld [vmem:[#allocation10 + $0xc8] sm:$0xff]  ;;  %v142_v35 = vld [vmem:[#allocation10 + $0x110] sm:$0xff] }
  0x49   :  { %182 = vmatprep.subr.mxu0 %v149_v18  ;;  %253 = vmatprep.subr.mxu1 %v151_v25  ;;  %v132_v36 = vld [vmem:[#allocation10 + $0xc0] sm:$0xff]  ;;  %v139_v37 = vld [vmem:[#allocation10 + $0xf8] sm:$0xff]  ;;  %v129_v38 = vld [vmem:[#allocation10 + $0xa8] sm:$0xff] }
  0x4a   :  { %183 = vmatpush1.msra.mxu0 %v148_v20  ;;  %254 = vmatpush1.msra.mxu1 %v150_v27  ;;  %v138_v39 = vld [vmem:[#allocation10 + $0xf0] sm:$0xff]  ;;  %v128_v40 = vld [vmem:[#allocation10 + $0xa0] sm:$0xff]  ;;  %v135_v41 = vld [vmem:[#allocation10 + $0xd8] sm:$0xff]  ;;  %v462_v20 = vlaneseq }
  0x4b   :  { %184 = vmatprep.subr.mxu0 %v145_v22  ;;  %255 = vmatprep.subr.mxu1 %v147_v29  ;;  %v125_v42 = vld [vmem:[#allocation10 + $0x88] sm:$0xff]  ;;  %v134_v43 = vld [vmem:[#allocation10 + $0xd0] sm:$0xff]  ;;  %v124_v44 = vld [vmem:[#allocation10 + $0x80] sm:$0xff] }
  0x4c   :  { %185 = vmatpush1.msra.mxu0 %v144_v24  ;;  %256 = vmatpush1.msra.mxu1 %v146_v31  ;;  %v131_v45 = vld [vmem:[#allocation10 + $0xb8] sm:$0xff]  ;;  %v121_v46 = vld [vmem:[#allocation10 + $0x68] sm:$0xff]  ;;  %v130_v47 = vld [vmem:[#allocation10 + $0xb0] sm:$0xff]  ;;  %v463_v21 = vshrl.u32 %v462_v20, 7 }
  0x4d   :  { %186 = vmatprep.subr.mxu0 %v141_v26  ;;  %257 = vmatprep.subr.mxu1 %v143_v33  ;;  %v120_v48 = vld [vmem:[#allocation10 + $0x60] sm:$0xff]  ;;  %v127_v49 = vld [vmem:[#allocation10 + $0x98] sm:$0xff]  ;;  %v117_v50 = vld [vmem:[#allocation10 + $0x48] sm:$0xff] }
  0x4e   :  { %187 = vmatpush1.msra.mxu0 %v140_v28  ;;  %258 = vmatpush1.msra.mxu1 %v142_v35  ;;  %v126_v51 = vld [vmem:[#allocation10 + $0x90] sm:$0xff]  ;;  %v116_v52 = vld [vmem:[#allocation10 + $0x40] sm:$0xff]  ;;  %v123_v53 = vld [vmem:[#allocation10 + $0x78] sm:$0xff]  ;;  %v464_v23 = vsub.s32 0, %v463_v21  ;;  %v468_v25 = vsub.s32 1, %v463_v21  ;;  %v472_v31 = vsub.s32 2, %v463_v21 }
  0x4f   :  { %188 = vmatprep.subr.mxu0 %v137_v30  ;;  %259 = vmatprep.subr.mxu1 %v139_v37  ;;  %v113_v54 = vld [vmem:[#allocation10 + $0x28] sm:$0xff]  ;;  %v122_v55 = vld [vmem:[#allocation10 + $0x70] sm:$0xff]  ;;  %v112_v56 = vld [vmem:[#allocation10 + $0x20] sm:$0xff] }
  0x50   :  { %189 = vmatpush1.msra.mxu0 %v136_v32  ;;  %260 = vmatpush1.msra.mxu1 %v138_v39  ;;  %v119_v57 = vld [vmem:[#allocation10 + $0x58] sm:$0xff]  ;;  %v109_v58 = vld [vmem:[#allocation10 + $0x8] sm:$0xff]  ;;  %v118_v59 = vld [vmem:[#allocation10 + $0x50] sm:$0xff] }
  0x51   :  { %190 = vmatprep.subr.mxu0 %v133_v34  ;;  %261 = vmatprep.subr.mxu1 %v135_v41  ;;  %v108_v60 = vld [vmem:[#allocation10] sm:$0xff]  ;;  %v115_v61 = vld [vmem:[#allocation10 + $0x38] sm:$0xff]  ;;  %v107_v62 = vld [vmem:[#allocation5] sm:$0xff] }
  0x52   :  { %191 = vmatpush1.msra.mxu0 %v132_v36  ;;  %262 = vmatpush1.msra.mxu1 %v134_v43  ;;  %v104_v63 = vld [vmem:[#allocation8 + $0x68] sm:$0xff]  ;;  %v103_v1 = vld [vmem:[#allocation8 + $0x60] sm:$0xff]  ;;  %v114_v2 = vld [vmem:[#allocation10 + $0x30] sm:$0xff] }
  0x53   :  { %192 = vmatprep.subr.mxu0 %v129_v38  ;;  %263 = vmatprep.subr.mxu1 %v131_v45  ;;  %v100_v3 = vld [vmem:[#allocation8 + $0x48] sm:$0xff]  ;;  %v111_v4 = vld [vmem:[#allocation10 + $0x18] sm:$0xff]  ;;  %v99_v5 = vld [vmem:[#allocation8 + $0x40] sm:$0xff] }
  0x54   :  { %193 = vmatpush1.msra.mxu0 %v128_v40  ;;  %264 = vmatpush1.msra.mxu1 %v130_v47  ;;  %v96_v6 = vld [vmem:[#allocation8 + $0x28] sm:$0xff]  ;;  %v110_v7 = vld [vmem:[#allocation10 + $0x10] sm:$0xff]  ;;  %v95_v8 = vld [vmem:[#allocation8 + $0x20] sm:$0xff] }
  0x55   :  { %194 = vmatprep.subr.mxu0 %v125_v42  ;;  %265 = vmatprep.subr.mxu1 %v127_v49  ;;  %v106_v9 = vld [vmem:[#allocation8 + $0x78] sm:$0xff]  ;;  %v92_v10 = vld [vmem:[#allocation8 + $0x8] sm:$0xff]  ;;  %v91_v11 = vld [vmem:[#allocation8] sm:$0xff] }
  0x56   :  { %195 = vmatpush1.msra.mxu0 %v124_v44  ;;  %266 = vmatpush1.msra.mxu1 %v126_v51  ;;  %v105_v12 = vld [vmem:[#allocation8 + $0x70] sm:$0xff]  ;;  %v90_v13 = vld [vmem:[#allocation2] sm:$0xff]  ;;  %v102_v14 = vld [vmem:[#allocation8 + $0x58] sm:$0xff]  ;;  %v476_v44 = vsub.s32 3, %v463_v21 }
  0x57   :  { %196 = vmatprep.subr.mxu0 %v121_v46  ;;  %267 = vmatprep.subr.mxu1 %v123_v53  ;;  %v101_v15 = vld [vmem:[#allocation8 + $0x50] sm:$0xff]  ;;  %v98_v16 = vld [vmem:[#allocation8 + $0x38] sm:$0xff]  ;;  %v460_v24 = vld [vmem:[%s860_s5] sm:$0xf]  ;;  %s768_s5 = smov [#allocation12]  }
  0x58   :  { %197 = vmatpush1.msra.mxu0 %v120_v48  ;;  %268 = vmatpush1.msra.mxu1 %v122_v55  ;;  %v97_v17 = vld [vmem:[#allocation8 + $0x30] sm:$0xff]  ;;  %v94_v18 = vld [vmem:[#allocation8 + $0x18] sm:$0xff]  ;;  %v465_v28 = vrot.slane %v460_v24, %v464_v23  ;;  %v469_v30 = vrot.slane %v460_v24, %v468_v25  ;;  %v473_v38 = vrot.slane %v460_v24, %v472_v31  ;;  %s530_s29 = sshll.u32 %s768_s5, 4  ;;  %s531_s29 = int_to_ptr.vmem [resolvable:$true] %s530_s29 }
  0x59   :  { %198 = vmatprep.subr.mxu0 %v117_v50  ;;  %269 = vmatprep.subr.mxu1 %v119_v57  ;;  %v93_v19 = vld [vmem:[#allocation8 + $0x10] sm:$0xff]  ;;  %v477_v47 = vrot.slane %v460_v24, %v476_v44  ;;  %s690_s10 = scalar_lea.vmem %s531_s29, 128  ;;  %p695_p12 = scmp.lt.s32.totalorder %s531_s29, %s531_s29 }
  0x5a   :  { %199 = vmatpush1.msra.mxu0 %v116_v52  ;;  %270 = vmatpush1.msra.mxu1 %v118_v59  ;;  %p691_p11 = scmp.ne.s32.totalorder %s531_s29, %s690_s10  ;;  %p696_p13 = scmp.lt.s32.totalorder %s690_s10, %s690_s10 }
  0x5b   :  { %200 = vmatprep.subr.mxu0 %v113_v54  ;;  %271 = vmatprep.subr.mxu1 %v115_v61 }
  0x5c   :  { %201 = vmatpush1.msra.mxu0 %v112_v56  ;;  %272 = vmatpush1.msra.mxu1 %v114_v2  ;;  %v505_v56 = vld [vmem:[#allocation7] sm:$0xff]  ;;  %p697_p0 = por %p696_p13, %p695_p12 }
  0x5d   :  { %202 = vmatprep.subr.mxu0 %v109_v58  ;;  %273 = vmatprep.subr.mxu1 %v111_v4 }
  0x5e   :  { %203 = vmatpush1.msra.mxu0 %v108_v60  ;;  %274 = vmatpush1.msra.mxu1 %v110_v7  ;;  %p698_p1 = pnand %p697_p0, %p691_p11 }
  0x5f   :  { %237 = vmatmul.mubr.f32.vlgmr.msra.gmra.mxu0 %v107_v62  ;;  %342 = vmatprep.subr.mxu0 %v104_v63 }
  0x60   :  { %343 = vmatpush1.msra.mxu0 %v103_v1  ;;  %382 = vmatprep.mubr.f32.mxu0 %v767_v0 }
  0x61   :  { %344 = vmatprep.subr.mxu0 %v100_v3  ;;  %413 = vmatprep.subr.mxu1 %v106_v9 }
  0x62   :  { %345 = vmatpush1.msra.mxu0 %v99_v5  ;;  %308 = vmatmul.mubr.f32.vlgmr.msra.gmra.mxu1 %v107_v62 }
  0x63   :  { %346 = vmatprep.subr.mxu0 %v96_v6  ;;  %414 = vmatpush1.msra.mxu1 %v105_v12 }
  0x64   :  { %347 = vmatpush1.msra.mxu0 %v95_v8  ;;  %415 = vmatprep.subr.mxu1 %v102_v14 }
  0x65   :  { %348 = vmatprep.subr.mxu0 %v92_v10  ;;  %416 = vmatpush1.msra.mxu1 %v101_v15 }
  0x66   :  { %349 = vmatpush1.msra.mxu0 %v91_v11  ;;  %453 = vmatprep.mubr.f32.mxu1 %v767_v0 }
  0x67   :  { %558 = vmatmul.mubr.msk.f32.vlgmr.msra.gmra.mxu0 %vm314_vm0, %v90_v13  ;;  %417 = vmatprep.subr.mxu1 %v98_v16 }
  0x68   :  { %418 = vmatpush1.msra.mxu1 %v97_v17 }
  0x69   :  { %419 = vmatprep.subr.mxu1 %v94_v18 }
  0x6a   :  { %420 = vmatpush1.msra.mxu1 %v93_v19 }
  0x6b   :  { %559 = vmatmul.mubr.msk.f32.vlgmr.msra.gmra.mxu1 %vm314_vm0, %v90_v13 }
 0x11f   :  { %v238_v22 = vpop.f32.mrf.mxu0 }
 0x121   :  { %v240_v26 = vpop.f32.mrf.mxu0 }
 0x122   :  { %v309_v27 = vpop.f32.mrf.mxu1 }
 0x124   :  { %v311_v33 = vpop.f32.mrf.mxu1 }
 0x127   :  { %v384_v0 = vpop.f32.mrf.mxu0 }
 0x128   :  { %v385_v29 = vadd.f32 %v384_v0, %v238_v22 }
 0x129   :  { %v386_v32 = vpop.f32.mrf.mxu0 }
 0x12a   :  { %v482_v34 = vadd.f32 %v465_v28, %v385_v29  ;;  %v387_v35 = vadd.f32 %v386_v32, %v240_v26 }
 0x12b   :  { %v455_v39 = vpop.f32.mrf.mxu1 }
 0x12c   :  { %v560_v36 = vmul.f32 -1.442695, %v482_v34  ;;  %v483_v37 = vadd.f32 %v469_v30, %v387_v35  ;;  %v456_v41 = vadd.f32 %v455_v39, %v309_v27 }
 0x12d   :  { %v457_v45 = vpop.f32.mrf.mxu1 }
 0x12e   :  { %574 = vpow2.f32 %v560_v36  ;;  %v561_v40 = vmul.f32 -1.442695, %v483_v37  ;;  %v484_v42 = vadd.f32 %v473_v38, %v456_v41  ;;  %v458_v46 = vadd.f32 %v457_v45, %v311_v33 }
 0x130   :  { %576 = vpow2.f32 %v561_v40  ;;  %v562_v43 = vmul.f32 -1.442695, %v484_v42  ;;  %v485_v49 = vadd.f32 %v477_v47, %v458_v46 }
 0x132   :  { %578 = vpow2.f32 %v562_v43 }
 0x13b   :  { %v575_v48 = vpop.eup %574 }
 0x13c   :  { %v495_v50 = vadd.f32 1.0, %v575_v48 }
 0x13d   :  { %v577_v51 = vpop.eup %576 }
 0x13e   :  { %580 = vrcp.f32 %v495_v50  ;;  %v496_v52 = vadd.f32 1.0, %v577_v51 }
 0x13f   :  { %582 = vtanh.f32 %v485_v49  ;;  %v579_v53 = vpop.eup %578 }
 0x140   :  { %584 = vrcp.f32 %v496_v52  ;;  %v497_v54 = vadd.f32 1.0, %v579_v53 }
 0x142   :  { %586 = vrcp.f32 %v497_v54 }
 0x14b   :  { %v581_v55 = vpop.eup %580 }
 0x14c   :  { %v583_v57 = vpop.eup %582 }
 0x14d   :  { %v585_v58 = vpop.eup %584  ;;  %v507_v60 = vmul.f32 %v583_v57, %v581_v55 }
 0x14e   :  { %v506_v59 = vmul.f32 %v585_v58, %v505_v56 }
 0x14f   :  { %v587_v62 = vpop.eup %586 }
 0x150   :  { %v508_v61 = vadd.f32 %v507_v60, %v506_v59  ;;  %513 = vst [vmem:[#allocation14] sm:$0xff] %v587_v62 }
 0x152   :  { %588 = vtanh.f32 %v508_v61  ;;  %512 = vst [vmem:[#allocation12] sm:$0xff] %v508_v61 }
 0x153   :  { %701 = shalt.err (!%p698_p1)
}
 0x154   :  { %533 = dma.vmem_to_hbm [thread:$0]  %s531_s29, 128, %s862_s7, [#allocation13]  }
 0x155   :  { %s710_s13 = scalar_lea.vmem %s541_s9, 128  ;;  %p715_p3 = scmp.lt.s32.totalorder %s541_s9, %s541_s9 }
 0x156   :  { %p711_p2 = scmp.ne.s32.totalorder %s541_s9, %s710_s13  ;;  %p716_p4 = scmp.lt.s32.totalorder %s710_s13, %s710_s13 }
 0x158   :  { %p717_p5 = por %p716_p4, %p715_p3 }
 0x15a   :  { %p718_p6 = pnand %p717_p5, %p711_p2 }
 0x15c   :  { %721 = shalt.err (!%p718_p6)
}
 0x15d   :  { %543 = dma.vmem_to_hbm [thread:$0]  %s541_s9, 128, %s863_s8, [#allocation13]  }
 0x15e   :  { %s770_s16 = smov [#allocation11]  }
 0x15f   :  { %s520_s17 = sshll.u32 %s770_s16, 4  ;;  %v589_v63 = vpop.eup %588  ;;  %s521_s17 = int_to_ptr.vmem [resolvable:$true] %s520_s17 }
 0x160   :  { %v510_v1 = vmul.f32 %v589_v63, %v587_v62  ;;  %s730_s18 = scalar_lea.vmem %s521_s17, 128  ;;  %p735_p8 = scmp.lt.s32.totalorder %s521_s17, %s521_s17 }
 0x161   :  { %p731_p7 = scmp.ne.s32.totalorder %s521_s17, %s730_s18  ;;  %p736_p9 = scmp.lt.s32.totalorder %s730_s18, %s730_s18 }
 0x162   :  { %511 = vst [vmem:[#allocation11] sm:$0xff] %v510_v1 }
 0x163   :  { %p737_p10 = por %p736_p9, %p735_p8 }
 0x165   :  { %p738_p11 = pnand %p737_p10, %p731_p7 }
 0x167   :  { %741 = shalt.err (!%p738_p11)
}
 0x168   :  { %523 = dma.vmem_to_hbm [thread:$0]  %s521_s17, 128, %s861_s6, [#allocation4]  }
 0x169   :  { %756 = dma.done.wait [#allocation4], 128  }
 0x16a   :  { %757 = vsyncadd [#allocation4], 4294967168 }
 0x16b   :  { %758 = dma.done.wait [#allocation13], 256  }
 0x16c   :  { %759 = vsyncadd [#allocation13], 4294967040 }
 0x16d   :  { %553 = vsyncpa [#allocation3], 1 }
 0x16e   :  { %554 = vsyncpa [#allocation6], 1 }
 0x16f   :  { %555 = vsyncpa [#allocation9], 1 }
 0x170   :  { %556 = vsyncpa [#allocation4], 1 }
 0x171   :  { %557 = vsyncpa [#allocation13], 1 }

</bundles_post_ra>
